<compile_context>
chip_gen: v6e
topology: v6e:2x2x1
jax: 0.10.0
libtpu: 0.0.40
codegen_flags: <defaults>
</compile_context>

<pallas_src>
import functools

import jax
import jax.numpy as jnp
import numpy as np
from jax.experimental import pallas as pl
from jax.experimental.pallas import tpu as pltpu

# Tap order (dh, dw) == (kh-1, kw-1), row-major — must match the K layout of
# the fused weight matrix built in the wrapper.
_TAPS = tuple((dh, dw) for dh in (-1, 0, 1) for dw in (-1, 0, 1))


def _resblock_kernel(x_ref, w_ref, mask_ref, ab_ref, out_ref, *, W):
    """Fused 3x3-conv + BN + ReLU + (1x1-conv + BN) skip + residual add.

    x_ref   : [Nb, Cin, HW]     f32   raw NCHW activations (flattened H*W)
    w_ref   : [2*Cout, 9*Cin]   bf16  fused conv+skip weights (tap-major K)
    mask_ref: [9*Cin, HW]       f32   {0,1} validity mask per tap-row
    ab_ref  : [Cout, 4]         f32   folded (bias + eval-BN) scale/offset
    out_ref : [Nb, Cout, HW]    bf16
    """
    nb, _, hw = x_ref.shape
    cout = out_ref.shape[1]

    w_big = w_ref[...]                       # [2*Cout, 9*Cin] bf16
    mask = mask_ref[...]                     # [9*Cin, HW] f32 (grid-invariant)
    sm = ab_ref[:, 0:1]                      # main-path scale
    bm = ab_ref[:, 1:2]                      # main-path offset
    ss = ab_ref[:, 2:3]                      # skip-path scale
    bs = ab_ref[:, 3:4]                      # skip-path offset

    def rotate(x, off):
        # result[:, p] = x[:, (p + off) % hw]; wrapped entries get masked out.
        off = off % hw
        if off == 0:
            return x
        return jnp.concatenate([x[:, off:], x[:, :off]], axis=1)

    for b in range(nb):                      # static unroll; Nb is small
        x_im = x_ref[b]                      # [Cin, HW] f32
        taps = [rotate(x_im, dh * W + dw) for dh, dw in _TAPS]
        act = jnp.concatenate(taps, axis=0)  # [9*Cin, HW] f32
        act = (act * mask).astype(jnp.bfloat16)

        # One MXU matmul covers the 3x3 conv (rows 0..Cout-1) AND the 1x1 skip
        # conv (rows Cout..2*Cout-1 — nonzero only in the center-tap K slice).
        res = jnp.dot(w_big, act, preferred_element_type=jnp.float32)
        main = res[:cout]                    # [Cout, HW] f32
        skip = res[cout:]                    # [Cout, HW] f32

        # Folded conv-bias + eval-BN scale/offset, ReLU, residual add (f32).
        y = jnp.maximum(main * sm + bm, 0.0) + skip * ss + bs
        out_ref[b] = y.astype(out_ref.dtype)


def _pick_block_n(n):
    """Images per grid step: amortize the ~0.35us per-step overhead for big N
    while keeping >= 2 grid steps so v7x megacore can split the batch."""
    if n <= 2:
        return 1
    for nb in (8, 4, 2):
        if n % nb == 0 and n // nb >= 2:
            return nb
    return 1


@jax.jit
def resblock_forward(x, params):
    """x: [N, Cin, H, W] (NCHW, like PyTorch). Returns [N, Cout, H, W] bf16."""
    N, Cin, H, W = x.shape
    Cout = params["w_conv"].shape[0]
    HW = H * W
    eps = 1e-5
    Nb = _pick_block_n(N)

    # Fold conv bias + eval-mode BatchNorm into per-channel scale/bias (f32).
    sm = params["bn_gamma"] / jnp.sqrt(params["bn_var"] + eps)
    bm = params["bn_beta"] + (params["b_conv"] - params["bn_mean"]) * sm
    ss = params["bns_gamma"] / jnp.sqrt(params["bns_var"] + eps)
    bs = params["bns_beta"] + (params["b_skip"] - params["bns_mean"]) * ss
    ab = jnp.stack([sm, bm, ss, bs], axis=1).astype(jnp.float32)   # [Cout, 4]

    # Fused weight matrix [2*Cout, 9*Cin]: rows 0..Cout-1 are the 3x3 conv in
    # tap-major / cin-minor K order; rows Cout..2*Cout-1 are the 1x1 skip conv
    # placed only in the center-tap (t=4) K slice.
    wc = jnp.transpose(params["w_conv"], (0, 2, 3, 1)).reshape(Cout, 9 * Cin)
    wskip = params["w_skip"].reshape(Cout, Cin)
    wskip_big = jnp.zeros((Cout, 9 * Cin), wskip.dtype)
    wskip_big = wskip_big.at[:, 4 * Cin:5 * Cin].set(wskip)
    w_big = jnp.concatenate([wc, wskip_big], axis=0).astype(jnp.bfloat16)

    # Static {0,1} validity mask (rotated taps wrap rows/columns; zero them).
    p = np.arange(HW)
    h_idx, w_idx = p // W, p % W
    mask9 = np.ones((9, HW), np.float32)
    for t, (dh, dw) in enumerate(_TAPS):
        m = np.ones(HW, bool)
        if dh == -1:
            m &= h_idx >= 1
        elif dh == 1:
            m &= h_idx <= H - 2
        if dw == -1:
            m &= w_idx >= 1
        elif dw == 1:
            m &= w_idx <= W - 2
        mask9[t] = m
    mask = jnp.asarray(np.repeat(mask9, Cin, axis=0))              # [9*Cin, HW]

    # Raw NCHW activations, flattened (free reshape; no cast/pad/transpose).
    x_flat = x.reshape(N, Cin, HW)

    flops = 2 * N * (2 * Cout) * (9 * Cin) * HW
    bytes_accessed = (N * Cin * HW * 4            # f32 activations in
                      + N * Cout * HW * 2         # bf16 output
                      + 2 * Cout * 9 * Cin * 2    # fused weights
                      + 9 * Cin * HW * 4          # validity mask
                      + Cout * 4 * 4)             # folded scale/offset

    kernel = functools.partial(_resblock_kernel, W=W)
    out = pl.pallas_call(
        kernel,
        out_shape=jax.ShapeDtypeStruct((N, Cout, HW), jnp.bfloat16),
        grid_spec=pltpu.PrefetchScalarGridSpec(
            num_scalar_prefetch=0,
            grid=(N // Nb,),
            in_specs=[
                pl.BlockSpec((Nb, Cin, HW), lambda n: (n, 0, 0)),
                pl.BlockSpec((2 * Cout, 9 * Cin), lambda n: (0, 0)),
                pl.BlockSpec((9 * Cin, HW), lambda n: (0, 0)),
                pl.BlockSpec((Cout, 4), lambda n: (0, 0)),
            ],
            out_specs=pl.BlockSpec((Nb, Cout, HW), lambda n: (n, 0, 0)),
        ),
        compiler_params=pltpu.CompilerParams(
            dimension_semantics=("parallel",)),
        cost_estimate=pl.CostEstimate(
            flops=flops, transcendentals=0, bytes_accessed=bytes_accessed),
    )(x_flat, w_big, mask, ab)

    # [N, Cout, HW] is already NCHW-ordered; reshape only (no transpose).
    # NOTE (v7x scaling): at real ResNet channel counts / resolutions, add an
    # HW (row-block) or Cout grid axis and set vmem_limit_bytes explicitly
    # (v7x has 64 MiB VMEM with a 32 MiB scoped default).
    return out.reshape(N, Cout, H, W)


def _reference_forward(x, params):
    """Pure-JAX reference (same math, f32) for verification."""
    eps = 1e-5
    dn = ("NCHW", "OIHW", "NCHW")
    conv = jax.lax.conv_general_dilated(
        x, params["w_conv"], window_strides=(1, 1), padding=((1, 1), (1, 1)),
        dimension_numbers=dn) + params["b_conv"][None, :, None, None]
    conv = (conv - params["bn_mean"][None, :, None, None]) / jnp.sqrt(
        params["bn_var"][None, :, None, None] + eps)
    conv = conv * params["bn_gamma"][None, :, None, None] + \
        params["bn_beta"][None, :, None, None]
    conv = jnp.maximum(conv, 0.0)

    skip = jax.lax.conv_general_dilated(
        x, params["w_skip"], window_strides=(1, 1), padding=((0, 0), (0, 0)),
        dimension_numbers=dn) + params["b_skip"][None, :, None, None]
    skip = (skip - params["bns_mean"][None, :, None, None]) / jnp.sqrt(
        params["bns_var"][None, :, None, None] + eps)
    skip = skip * params["bns_gamma"][None, :, None, None] + \
        params["bns_beta"][None, :, None, None]
    return conv + skip


def make_params(in_feat, out_feat, key):
    ks = jax.random.split(key, 8)
    return {
        "w_conv": 0.1 * jax.random.normal(ks[0], (out_feat, in_feat, 3, 3),
                                          jnp.float32),
        "b_conv": 0.1 * jax.random.normal(ks[1], (out_feat,), jnp.float32),
        "w_skip": 0.1 * jax.random.normal(ks[2], (out_feat, in_feat, 1, 1),
                                          jnp.float32),
        "b_skip": 0.1 * jax.random.normal(ks[3], (out_feat,), jnp.float32),
        # BatchNorm (main) — eval-mode running stats + affine params
        "bn_gamma": 1.0 + 0.1 * jax.random.normal(ks[4], (out_feat,), jnp.float32),
        "bn_beta": 0.1 * jax.random.normal(ks[5], (out_feat,), jnp.float32),
        "bn_mean": 0.05 * jnp.arange(out_feat, dtype=jnp.float32),
        "bn_var": 1.0 + 0.02 * jnp.arange(out_feat, dtype=jnp.float32),
        # BatchNorm (skip)
        "bns_gamma": 1.0 + 0.1 * jax.random.normal(ks[6], (out_feat,), jnp.float32),
        "bns_beta": 0.1 * jax.random.normal(ks[7], (out_feat,), jnp.float32),
        "bns_mean": 0.03 * jnp.arange(out_feat, dtype=jnp.float32),
        "bns_var": 1.0 + 0.01 * jnp.arange(out_feat, dtype=jnp.float32),
    }


if __name__ == "__main__":
    # ResBlock(in_feat=4, out_feat=8, k_size=3, stride=1, padding=True,
    #          pool=False, batch_norm=True) — in_feat != out_feat, so the
    #          1x1-conv+BN skip path is active and the residual add fires.
    N, Cin, H, W = 2, 4, 16, 16
    Cout = 8

    key = jax.random.PRNGKey(0)
    kx, kp = jax.random.split(key)
    x = jax.random.normal(kx, (N, Cin, H, W), jnp.float32)
    params = make_params(Cin, Cout, kp)

    out = resblock_forward(x, params)
    out = jax.block_until_ready(out)

    ref = _reference_forward(x, params)
    # bf16 MXU inputs + bf16 output (f32 accumulation/epilogue) => loose tol.
    np.testing.assert_allclose(np.asarray(out.astype(jnp.float32)),
                               np.asarray(ref), rtol=5e-2, atol=5e-2)
    assert out.shape == (N, Cout, H, W)
    print("KERNEL_OK")
</pallas_src>

<mosaic_0001>
module attributes {stable_mosaic.version = 11 : i64} {
  func.func @_resblock_kernel(%arg0: i32, %arg1: memref<1x4x256xf32, #tpu.memory_space<vmem>>, %arg2: memref<16x36xbf16, #tpu.memory_space<vmem>>, %arg3: memref<36x256xf32, #tpu.memory_space<vmem>>, %arg4: memref<8x4xf32, #tpu.memory_space<vmem>>, %arg5: memref<1x8x256xbf16, #tpu.memory_space<vmem>>) attributes {dimension_semantics = [#tpu.dimension_semantics<parallel>], iteration_bounds = array<i64: 2>, scalar_prefetch = 0 : i64, scratch_operands = 0 : i64, tpu.core_type = #tpu.core_type<tc>, window_params = [{transform_indices = @transform_0, window_bounds = array<i64: 1, 4, 256>}, {pipeline_mode = #tpu.pipeline_mode<synchronous>, transform_indices = @transform_1, window_bounds = array<i64: 16, 36>}, {pipeline_mode = #tpu.pipeline_mode<synchronous>, transform_indices = @transform_2, window_bounds = array<i64: 36, 256>}, {pipeline_mode = #tpu.pipeline_mode<synchronous>, transform_indices = @transform_3, window_bounds = array<i64: 8, 4>}, {transform_indices = @transform_4, window_bounds = array<i64: 1, 8, 256>}]} {
    %c0 = arith.constant 0 : index
    %c0_0 = arith.constant 0 : index
    %0 = vector.load %arg2[%c0, %c0_0] : memref<16x36xbf16, #tpu.memory_space<vmem>>, vector<16x36xbf16>
    %c0_1 = arith.constant 0 : index
    %c0_2 = arith.constant 0 : index
    %1 = vector.load %arg3[%c0_1, %c0_2] : memref<36x256xf32, #tpu.memory_space<vmem>>, vector<36x256xf32>
    %c0_3 = arith.constant 0 : index
    %c0_4 = arith.constant 0 : index
    %2 = vector.load %arg4[%c0_3, %c0_4] : memref<8x4xf32, #tpu.memory_space<vmem>>, vector<8x1xf32>
    %c0_5 = arith.constant 0 : index
    %c1 = arith.constant 1 : index
    %3 = vector.load %arg4[%c0_5, %c1] : memref<8x4xf32, #tpu.memory_space<vmem>>, vector<8x1xf32>
    %c0_6 = arith.constant 0 : index
    %c2 = arith.constant 2 : index
    %4 = vector.load %arg4[%c0_6, %c2] : memref<8x4xf32, #tpu.memory_space<vmem>>, vector<8x1xf32>
    %c0_7 = arith.constant 0 : index
    %c3 = arith.constant 3 : index
    %5 = vector.load %arg4[%c0_7, %c3] : memref<8x4xf32, #tpu.memory_space<vmem>>, vector<8x1xf32>
    %c0_8 = arith.constant 0 : index
    %c0_9 = arith.constant 0 : index
    %c0_10 = arith.constant 0 : index
    %6 = vector.load %arg1[%c0_8, %c0_9, %c0_10] : memref<1x4x256xf32, #tpu.memory_space<vmem>>, vector<1x4x256xf32>
    %7 = vector.shape_cast %6 : vector<1x4x256xf32> to vector<4x256xf32>
    %8 = vector.extract_strided_slice %7 {offsets = [0, 239], sizes = [4, 17], strides = [1, 1]} : vector<4x256xf32> to vector<4x17xf32>
    %9 = vector.extract_strided_slice %7 {offsets = [0, 0], sizes = [4, 239], strides = [1, 1]} : vector<4x256xf32> to vector<4x239xf32>
    %10 = tpu.concatenate %8, %9 in 1 : vector<4x17xf32>, vector<4x239xf32> -> vector<4x256xf32>
    %11 = vector.extract_strided_slice %7 {offsets = [0, 240], sizes = [4, 16], strides = [1, 1]} : vector<4x256xf32> to vector<4x16xf32>
    %12 = vector.extract_strided_slice %7 {offsets = [0, 0], sizes = [4, 240], strides = [1, 1]} : vector<4x256xf32> to vector<4x240xf32>
    %13 = tpu.concatenate %11, %12 in 1 : vector<4x16xf32>, vector<4x240xf32> -> vector<4x256xf32>
    %14 = vector.extract_strided_slice %7 {offsets = [0, 241], sizes = [4, 15], strides = [1, 1]} : vector<4x256xf32> to vector<4x15xf32>
    %15 = vector.extract_strided_slice %7 {offsets = [0, 0], sizes = [4, 241], strides = [1, 1]} : vector<4x256xf32> to vector<4x241xf32>
    %16 = tpu.concatenate %14, %15 in 1 : vector<4x15xf32>, vector<4x241xf32> -> vector<4x256xf32>
    %17 = vector.extract_strided_slice %7 {offsets = [0, 255], sizes = [4, 1], strides = [1, 1]} : vector<4x256xf32> to vector<4x1xf32>
    %18 = vector.extract_strided_slice %7 {offsets = [0, 0], sizes = [4, 255], strides = [1, 1]} : vector<4x256xf32> to vector<4x255xf32>
    %19 = tpu.concatenate %17, %18 in 1 : vector<4x1xf32>, vector<4x255xf32> -> vector<4x256xf32>
    %20 = vector.extract_strided_slice %7 {offsets = [0, 1], sizes = [4, 255], strides = [1, 1]} : vector<4x256xf32> to vector<4x255xf32>
    %21 = vector.extract_strided_slice %7 {offsets = [0, 0], sizes = [4, 1], strides = [1, 1]} : vector<4x256xf32> to vector<4x1xf32>
    %22 = tpu.concatenate %20, %21 in 1 : vector<4x255xf32>, vector<4x1xf32> -> vector<4x256xf32>
    %23 = vector.extract_strided_slice %7 {offsets = [0, 15], sizes = [4, 241], strides = [1, 1]} : vector<4x256xf32> to vector<4x241xf32>
    %24 = vector.extract_strided_slice %7 {offsets = [0, 0], sizes = [4, 15], strides = [1, 1]} : vector<4x256xf32> to vector<4x15xf32>
    %25 = tpu.concatenate %23, %24 in 1 : vector<4x241xf32>, vector<4x15xf32> -> vector<4x256xf32>
    %26 = vector.extract_strided_slice %7 {offsets = [0, 16], sizes = [4, 240], strides = [1, 1]} : vector<4x256xf32> to vector<4x240xf32>
    %27 = vector.extract_strided_slice %7 {offsets = [0, 0], sizes = [4, 16], strides = [1, 1]} : vector<4x256xf32> to vector<4x16xf32>
    %28 = tpu.concatenate %26, %27 in 1 : vector<4x240xf32>, vector<4x16xf32> -> vector<4x256xf32>
    %29 = vector.extract_strided_slice %7 {offsets = [0, 17], sizes = [4, 239], strides = [1, 1]} : vector<4x256xf32> to vector<4x239xf32>
    %30 = vector.extract_strided_slice %7 {offsets = [0, 0], sizes = [4, 17], strides = [1, 1]} : vector<4x256xf32> to vector<4x17xf32>
    %31 = tpu.concatenate %29, %30 in 1 : vector<4x239xf32>, vector<4x17xf32> -> vector<4x256xf32>
    %32 = tpu.concatenate %10, %13, %16, %19, %7, %22, %25, %28, %31 in 0 : vector<4x256xf32>, vector<4x256xf32>, vector<4x256xf32>, vector<4x256xf32>, vector<4x256xf32>, vector<4x256xf32>, vector<4x256xf32>, vector<4x256xf32>, vector<4x256xf32> -> vector<36x256xf32>
    %33 = arith.mulf %32, %1 : vector<36x256xf32>
    %34 = arith.truncf %33 : vector<36x256xf32> to vector<36x256xbf16>
    %cst = arith.constant dense<0.000000e+00> : vector<16x256xf32>
    %35 = tpu.matmul %0, %34, %cst {dimension_numbers = #tpu.dot_dimension_numbers<[1], [0], [0], [1], [0, 0, 1, 1], [], []>} : vector<16x36xbf16>, vector<36x256xbf16>, vector<16x256xf32> -> vector<16x256xf32>
    %36 = vector.extract_strided_slice %35 {offsets = [0, 0], sizes = [8, 256], strides = [1, 1]} : vector<16x256xf32> to vector<8x256xf32>
    %37 = vector.extract_strided_slice %35 {offsets = [8, 0], sizes = [8, 256], strides = [1, 1]} : vector<16x256xf32> to vector<8x256xf32>
    %38 = vector.broadcast %2 : vector<8x1xf32> to vector<8x256xf32>
    %39 = arith.mulf %36, %38 : vector<8x256xf32>
    %40 = vector.broadcast %3 : vector<8x1xf32> to vector<8x256xf32>
    %41 = arith.addf %39, %40 : vector<8x256xf32>
    %cst_11 = arith.constant 0.000000e+00 : f32
    %42 = vector.broadcast %cst_11 : f32 to vector<8x256xf32>
    %43 = arith.maximumf %41, %42 : vector<8x256xf32>
    %44 = vector.broadcast %4 : vector<8x1xf32> to vector<8x256xf32>
    %45 = arith.mulf %37, %44 : vector<8x256xf32>
    %46 = arith.addf %43, %45 : vector<8x256xf32>
    %47 = vector.broadcast %5 : vector<8x1xf32> to vector<8x256xf32>
    %48 = arith.addf %46, %47 : vector<8x256xf32>
    %49 = arith.truncf %48 : vector<8x256xf32> to vector<8x256xbf16>
    %c0_12 = arith.constant 0 : index
    %c0_13 = arith.constant 0 : index
    %c0_14 = arith.constant 0 : index
    %50 = vector.load %arg5[%c0_12, %c0_13, %c0_14] : memref<1x8x256xbf16, #tpu.memory_space<vmem>>, vector<1x8x256xbf16>
    %51 = vector.shape_cast %50 : vector<1x8x256xbf16> to vector<8x256xbf16>
    %52 = vector.shape_cast %49 : vector<8x256xbf16> to vector<1x8x256xbf16>
    tpu.vector_store %arg5[%c0_12, %c0_13, %c0_14], %52 {strides = array<i32>} : memref<1x8x256xbf16, #tpu.memory_space<vmem>>, vector<1x8x256xbf16>,
    return
  }
  func.func @transform_0(%arg0: i32) -> (i32, i32, i32) {
    %c0_i32 = arith.constant 0 : i32
    %c0_i32_0 = arith.constant 0 : i32
    %c0_i32_1 = arith.constant 0 : i32
    return %arg0, %c0_i32, %c0_i32_0 : i32, i32, i32
  }
  func.func @transform_1(%arg0: i32) -> (i32, i32) {
    %c0_i32 = arith.constant 0 : i32
    %c0_i32_0 = arith.constant 0 : i32
    %c0_i32_1 = arith.constant 0 : i32
    return %c0_i32, %c0_i32_0 : i32, i32
  }
  func.func @transform_2(%arg0: i32) -> (i32, i32) {
    %c0_i32 = arith.constant 0 : i32
    %c0_i32_0 = arith.constant 0 : i32
    %c0_i32_1 = arith.constant 0 : i32
    return %c0_i32, %c0_i32_0 : i32, i32
  }
  func.func @transform_3(%arg0: i32) -> (i32, i32) {
    %c0_i32 = arith.constant 0 : i32
    %c0_i32_0 = arith.constant 0 : i32
    %c0_i32_1 = arith.constant 0 : i32
    return %c0_i32, %c0_i32_0 : i32, i32
  }
  func.func @transform_4(%arg0: i32) -> (i32, i32, i32) {
    %c0_i32 = arith.constant 0 : i32
    %c0_i32_0 = arith.constant 0 : i32
    %c0_i32_1 = arith.constant 0 : i32
    return %arg0, %c0_i32, %c0_i32_0 : i32, i32, i32
  }
}

</mosaic_0001>

<bundles_post_ra>
// kernel: resblock_forward.1
= control target key start
LH: loop header
LB: loop body
LE: loop exit
PB: predicated region body
PF: predicated region fallthrough
CT: control target
= control target key end

     0   :  { %s578_s15 = smov 0   ;;  %s663_s0 = inlined_call_operand.vmem [shape: f32[2,4,256], index: 0, kind: input, shape index: {}]   ;;  %s664_s1 = inlined_call_operand.vmem [shape: bf16[16,36], index: 1, kind: input, shape index: {}]   ;;  %s665_s2 = inlined_call_operand.vmem [shape: f32[36,256], index: 2, kind: input, shape index: {}]   ;;  %s666_s3 = inlined_call_operand.vmem [shape: f32[8,4], index: 3, kind: input, shape index: {}]   ;;  %s667_s4 = inlined_call_operand.vmem [shape: bf16[2,8,256], index: 4, kind: output, shape index: {}]  }
   0x1 LB: > { %s489_s16 = sadd.s32 4294967295, %s539_s15   ;;  %p493_p0 = scmp.ge.s32.totalorder %s539_s15, 1  ;;  %s539_s15 = sphi %s578_s15, %s14_s15  }
   0x2   : > { %p162_p1 = scmp.lt.s32.totalorder %s539_s15, 3 }
   0x4   : > { %p163_p2 = pnand %p493_p0, %p162_p1 }
   0x5   : > { %p188_p3 = scmp.lt.s32.totalorder (!%p163_p2), %s489_s16, 1  ;;  %s541_s21 = smov (!%p163_p2), 127  }
   0x6   : > { %166 = sbr.rel (%p163_p2) target bundleno = 376 (0x178), region = 36  ;;  %s542_s22 = smov (!%p163_p2), 111  }
   0x7   : > { %s543_s23 = smov (!%p163_p2), 112   ;;  %s544_s24 = smov (!%p163_p2), 113  }
   0x8   : > { %s545_s25 = smov (!%p163_p2), 16   ;;  %s546_s26 = smov (!%p163_p2), 1  }
   0x9   : > { %s548_s27 = smov (!%p163_p2), 17   ;;  %s550_s28 = smov (!%p163_p2), 15  }
   0xb   : > { %s669_s16 = smov (!%p188_p3, %s489_s16), 1  ;;  %v547_v2 = vmov 0   ;;  %v549_v3 = vmov 1   ;;  %v211_v4 = vld [vmem:[%s666_s3] sm:$0xff]  ;;  %v551_v5 = vmov 2   ;;  %v552_v6 = vmov 3  }
   0xc   : > { %s504_s17 = sshll.u32 %s669_s16, 3  ;;  %385 = vmatprep.mubr.bf16.mxu0 %v547_v2  ;;  %527 = vset.pattern.permute.xlu0 %v547_v2  ;;  %vm257_vm0 = vcmask 1039360   ;;  %vm276_vm1 = vcmask 916480   ;;  %vm285_vm2 = vcmask 908288   ;;  %v209_v15 = vld [vmem:[%s665_s2 + $0x40] sm:$0xf] }
   0xd   : > { %s192_s20 = scalar_lea.vmem %s663_s0, %s504_s17  ;;  %528 = vset.pattern.permute.xlu1 %v549_v3  ;;  %v210_v16 = vld [vmem:[%s665_s2 + $0x48] sm:$0xf]  ;;  %vm312_vm3 = vcmask 1043456   ;;  %vm266_vm4 = vcmask 924672   ;;  %vm346_vm5 = vcmask 1041408   ;;  %v207_v31 = vld [vmem:[%s665_s2 + $0x30] sm:$0xff]  ;;  %s197_s6 = scalar_lea.vmem %s667_s4, %s504_s17 }
   0xe   : > { %v594_v0 = vld [vmem:[%s192_s20] sm:$0xff]  ;;  %v206_v27 = vld [vmem:[%s665_s2 + $0x28] sm:$0xff]  ;;  %v208_v32 = vld [vmem:[%s665_s2 + $0x38] sm:$0xff]  ;;  %vm230_vm6 = vcmask 130048   ;;  %vm249_vm7 = vcmask 7168   ;;  %vm220_vm8 = vcmask 138240  }
   0xf   : > { %253 = vrot.lane.b32.xlu1 %v594_v0, %s541_s21  ;;  %281 = vrot.lane.b32.xlu0 %v594_v0, %s542_s22  ;;  %v214_v1 = vcombine.high %v594_v0, %v594_v0  ;;  %v205_v36 = vld [vmem:[%s665_s2 + $0x20] sm:$0xff]  ;;  %vm239_vm9 = vcmask 121856   ;;  %vm342_vm10 = vcmask 293888  }
  0x10   : > { %v201_v62 = vld [vmem:[%s665_s2] sm:$0xff] }
  0x13   : > { %272 = vrot.lane.b32.xlu0 %v594_v0, %s543_s23  ;;  %255 = vrot.lane.b32.xlu1 %v214_v1, %s541_s21 }
  0x17   : > { %274 = vrot.lane.b32.xlu1 %v214_v1, %s543_s23  ;;  %283 = vrot.lane.b32.xlu0 %v214_v1, %s542_s22 }
  0x1b   : > { %264 = vrot.lane.b32.xlu1 %v214_v1, %s544_s24  ;;  %262 = vrot.lane.b32.xlu0 %v594_v0, %s544_s24 }
  0x1f   : > { %228 = vrot.lane.b32.xlu1 %v594_v0, %s545_s25  ;;  %225 = vrot.lane.b32.xlu0 %v214_v1, %s545_s25 }
  0x23   : > { %247 = vrot.lane.b32.xlu1 %v594_v0, %s546_s26  ;;  %244 = vrot.lane.b32.xlu0 %v214_v1, %s546_s26 }
  0x27   : > { %218 = vrot.lane.b32.xlu1 %v594_v0, %s548_s27  ;;  %215 = vrot.lane.b32.xlu0 %v214_v1, %s548_s27 }
  0x2b   : > { %237 = vrot.lane.b32.xlu1 %v594_v0, %s550_s28  ;;  %234 = vrot.lane.b32.xlu0 %v214_v1, %s550_s28 }
  0x2f   : > { %404 = vperm.xlu1 %528, %v211_v4   ;;  %398 = vperm.xlu0 %527, %v211_v4  }
  0x33   : > { %529 = vset.pattern.permute.xlu1 %v551_v5  ;;  %530 = vset.pattern.permute.xlu0 %v552_v6  ;;  %v203_v5 = vld [vmem:[%s665_s2 + $0x10] sm:$0xff]  ;;  %v204_v6 = vld [vmem:[%s665_s2 + $0x18] sm:$0xff] }
  0x34   : > { %412 = vperm.xlu1 %529, %v211_v4   ;;  %420 = vperm.xlu0 %530, %v211_v4  }
  0x81   : > { %v254_v7 = vpop.permute.xlu1 %253  ;;  %v282_v8 = vpop.permute.xlu0 %281 }
  0x85   : > { %v273_v9 = vpop.permute.xlu0 %272  ;;  %v256_v10 = vpop.permute.xlu1 %255 }
  0x86   : > { %v258_v11 = vsel %vm257_vm0, %v254_v7, %v256_v10  ;;  %v261_v12 = vsel %vm257_vm0, %v256_v10, %v254_v7 }
  0x87   : > { %v303_v13 = vrot.slane %v258_v11, 4  ;;  %v304_v14 = vrot.slane %v261_v12, 4 }
  0x89   : > { %v275_v17 = vpop.permute.xlu1 %274  ;;  %v284_v18 = vpop.permute.xlu0 %283  ;;  %v317_v25 = vsel %vm312_vm3, %v594_v0, %v303_v13  ;;  %v318_v26 = vsel %vm312_vm3, %v214_v1, %v304_v14  ;;  %v202_v1 = vld [vmem:[%s665_s2 + $0x8] sm:$0xff] }
  0x8a   : > { %v277_v19 = vsel %vm276_vm1, %v273_v9, %v275_v17  ;;  %v280_v20 = vsel %vm276_vm1, %v275_v17, %v273_v9  ;;  %v286_v21 = vsel %vm285_vm2, %v282_v8, %v284_v18  ;;  %v290_v22 = vsel %vm285_vm2, %v284_v18, %v282_v8  ;;  %v532_v18 = vld [vmem:[%s664_s1] sm:$0xff]  }
  0x8b   : > { %v329_v23 = vmul.f32 %v286_v21, %v209_v15  ;;  %v330_v24 = vmul.f32 %v290_v22, %v210_v16  ;;  %v308_v28 = vrot.slane %v277_v19, 4  ;;  %v309_v29 = vrot.slane %v280_v20, 4 }
  0x8c   : > { %v326_v44 = vmul.f32 %v318_v26, %v206_v27  ;;  %v325_v45 = vmul.f32 %v317_v25, %v205_v36 }
  0x8d   : > { %v265_v30 = vpop.permute.xlu1 %264  ;;  %v263_v33 = vpop.permute.xlu0 %262  ;;  %v336_v34 = vpack.c.bf16 %v330_v24, %v330_v24  ;;  %v335_v35 = vpack.c.bf16 %v329_v23, %v329_v23 }
  0x8e   : > { %v267_v37 = vsel %vm266_vm4, %v263_v33, %v265_v30  ;;  %v271_v38 = vsel %vm266_vm4, %v265_v30, %v263_v33 }
  0x8f   : > { %v319_v39 = vsel %vm312_vm3, %v267_v37, %v308_v28  ;;  %v320_v40 = vsel %vm312_vm3, %v271_v38, %v309_v29  ;;  %499 = vmatprep.subr.msk.bf16.mxu0 %vm346_vm5, %v336_v34  ;;  %v348_v41 = vsel %vm346_vm5, %v335_v35, 0 }
  0x90   : > { %v327_v42 = vmul.f32 %v319_v39, %v207_v31  ;;  %v328_v43 = vmul.f32 %v320_v40, %v208_v32  ;;  %364 = vmatpush1.bf16.msra.mxu0 %v348_v41 }
  0x91   : > { %v229_v46 = vpop.permute.xlu1 %228  ;;  %v226_v47 = vpop.permute.xlu0 %225 }
  0x92   : > { %v334_v48 = vpack.c.bf16 %v328_v43, %v326_v44  ;;  %v333_v49 = vpack.c.bf16 %v327_v42, %v325_v45  ;;  %v231_v52 = vsel %vm230_vm6, %v229_v46, %v226_v47  ;;  %v233_v53 = vsel %vm230_vm6, %v226_v47, %v229_v46 }
  0x93   : > { %v292_v60 = vrot.slane %v233_v53, 4  ;;  %v293_v61 = vrot.slane %v231_v52, 4 }
  0x94   : > { %365 = vmatprep.subr.bf16.mxu0 %v334_v48 }
  0x95   : > { %v248_v50 = vpop.permute.xlu1 %247  ;;  %366 = vmatpush1.bf16.msra.mxu0 %v333_v49  ;;  %v245_v51 = vpop.permute.xlu0 %244 }
  0x96   : > { %v250_v56 = vsel %vm249_vm7, %v248_v50, %v245_v51  ;;  %v252_v57 = vsel %vm249_vm7, %v245_v51, %v248_v50 }
  0x97   : > { %v297_v63 = vrot.slane %v252_v57, 4  ;;  %v298_v0 = vrot.slane %v250_v56, 4 }
  0x99   : > { %v219_v54 = vpop.permute.xlu1 %218  ;;  %v216_v55 = vpop.permute.xlu0 %215 }
  0x9a   : > { %v221_v58 = vsel %vm220_vm8, %v219_v54, %v216_v55  ;;  %v224_v59 = vsel %vm220_vm8, %v216_v55, %v219_v54 }
  0x9b   : > { %v313_v2 = vsel %vm312_vm3, %v224_v59, %v292_v60  ;;  %v314_v3 = vsel %vm312_vm3, %v221_v58, %v293_v61 }
  0x9c   : > { %v321_v12 = vmul.f32 %v313_v2, %v201_v62  ;;  %v322_v13 = vmul.f32 %v314_v3, %v202_v1 }
  0x9d   : > { %v238_v4 = vpop.permute.xlu1 %237  ;;  %v235_v7 = vpop.permute.xlu0 %234 }
  0x9e   : > { %v240_v8 = vsel %vm239_vm9, %v238_v4, %v235_v7  ;;  %v243_v9 = vsel %vm239_vm9, %v235_v7, %v238_v4 }
  0x9f   : > { %v315_v10 = vsel %vm312_vm3, %v243_v9, %v297_v63  ;;  %v316_v11 = vsel %vm312_vm3, %v240_v8, %v298_v0 }
  0xa0   : > { %v323_v14 = vmul.f32 %v315_v10, %v203_v5  ;;  %v324_v15 = vmul.f32 %v316_v11, %v204_v6 }
  0xa2   : > { %v332_v16 = vpack.c.bf16 %v324_v15, %v322_v13  ;;  %v331_v17 = vpack.c.bf16 %v323_v14, %v321_v12 }
  0xa4   : > { %367 = vmatprep.subr.bf16.mxu0 %v332_v16 }
  0xa5   : > { %368 = vmatpush1.bf16.msra.mxu0 %v331_v17 }
  0xa8   : > { %500 = vmatmul.mubr.msk.bf16.vlgmr.msra.gmra.mxu0 %vm342_vm10, %v532_v18 }
  0xaa   : > { %v405_v19 = vpop.permute.xlu1 %404  ;;  %v399_v20 = vpop.permute.xlu0 %398 }
  0xaf   : > { %v413_v24 = vpop.permute.xlu1 %412  ;;  %v421_v35 = vpop.permute.xlu0 %420 }
 0x168   : > { %v387_v21 = vpop.f32.mrf.mxu0 }
 0x169   : > { %v401_v22 = vmul.f32 %v399_v20, %v387_v21 }
 0x16a   : > { %v389_v23 = vpop.f32.mrf.mxu0 }
 0x16b   : > { %v407_v25 = vadd.f32 %v405_v19, %v401_v22  ;;  %v402_v26 = vmul.f32 %v399_v20, %v389_v23 }
 0x16c   : > { %v391_v27 = vpop.f32.mrf.mxu0 }
 0x16d   : > { %v409_v28 = vmax.f32 %v407_v25, 0.0  ;;  %v408_v29 = vadd.f32 %v405_v19, %v402_v26  ;;  %v415_v30 = vmul.f32 %v413_v24, %v391_v27 }
 0x16e   : > { %v393_v31 = vpop.f32.mrf.mxu0 }
 0x16f   : > { %v410_v32 = vmax.f32 %v408_v29, 0.0  ;;  %v416_v33 = vmul.f32 %v413_v24, %v393_v31  ;;  %v417_v34 = vadd.f32 %v415_v30, %v409_v28 }
 0x171   : > { %v418_v36 = vadd.f32 %v416_v33, %v410_v32  ;;  %v423_v37 = vadd.f32 %v421_v35, %v417_v34 }
 0x173   : > { %v424_v38 = vadd.f32 %v421_v35, %v418_v36 }
 0x175   : > { %v506_v39 = vpack.c.bf16 %v424_v38, %v423_v37 }
 0x177   : > { %433 = vst [vmem:[%s197_s6] sm:$0xff] %v506_v39 }
 0x178 PF: > { %s14_s15 = sadd.s32 1, %s539_s15  }
 0x179   : > { %p11_p4 = scmp.ge.s32.totalorder %s14_s15, 4  }
 0x17b   :  { %13 = sbr.rel (!%p11_p4) target bundleno = 1 (0x1), region = 66 }

</bundles_post_ra>
